<compile_context>
chip_gen: v7x
topology: tpu7x:2x2x1
jax: 0.10.0
libtpu: 0.0.40
codegen_flags: <defaults>
</compile_context>

<pallas_src>
import jax
import jax.numpy as jnp
from jax.experimental import pallas as pl
from jax.experimental.pallas import tpu as pltpu

IN_DIM = 784
H1 = 20
H2 = 20
OUT_DIM = 10


def _mlp_kernel(x_ref, w1_ref, b1_ref, w2_ref, b2_ref, w3_ref, b3_ref, o_ref):
    x = x_ref[...]  # (tb, 784), streamed dtype (bf16 by default)

    # Layer 1: Linear(784, 20) + ReLU   (f32 accumulation on the MXU)
    h1 = jnp.dot(x, w1_ref[...], preferred_element_type=jnp.float32) + b1_ref[...]
    h1 = jnp.maximum(h1, 0.0).astype(x.dtype)

    # Layer 2: Linear(20, 20) + ReLU
    h2 = jnp.dot(h1, w2_ref[...], preferred_element_type=jnp.float32) + b2_ref[...]
    h2 = jnp.maximum(h2, 0.0).astype(x.dtype)

    # Layer 3: Linear(20, 10) + ReLU
    h3 = jnp.dot(h2, w3_ref[...], preferred_element_type=jnp.float32) + b3_ref[...]
    o_ref[...] = jnp.maximum(h3, 0.0).astype(o_ref.dtype)


def recognizer_forward(x, params, *, batch_tile=None, compute_dtype=jnp.bfloat16):
    """Forward pass of the Recognizer MLP.

    x:       (B, 784) float32 (or any float dtype).
    params:  dict with w1,b1,w2,b2,w3,b3 (w stored as (in, out), b as (1, out), f32).
    batch_tile: rows per grid step.  Default min(B, 1024): big enough to amortize the
                ~0.35 us/step grid overhead and sit near the HBM roofline, small enough
                to keep double-buffered tiles well inside scoped VMEM on v5e/v6e/v7x
                and give v7x's two TensorCores multiple parallel grid steps.
    compute_dtype: dtype used to stream x and weights (bf16 halves HBM bytes; matmuls
                   still accumulate in f32).
    """
    B = x.shape[0]

    tb = min(batch_tile if batch_tile is not None else 1024, B)
    if tb < B:
        # Multi-step grid: the batch block dim must satisfy the (8, 128) sublane rule.
        tb = max(8, (tb // 8) * 8)
    grid_b = pl.cdiv(B, tb)
    B_pad = grid_b * tb

    x_in = x.astype(compute_dtype)
    if B_pad != B:
        x_in = jnp.pad(x_in, ((0, B_pad - B), (0, 0)))

    # Cast weights in the wrapper; biases stay f32 (added to the f32 accumulator).
    w1 = params["w1"].astype(compute_dtype)
    w2 = params["w2"].astype(compute_dtype)
    w3 = params["w3"].astype(compute_dtype)
    b1, b2, b3 = params["b1"], params["b2"], params["b3"]

    in_specs = [
        pl.BlockSpec((tb, IN_DIM), lambda i: (i, 0)),      # x: tiled over batch
        # Constant index_maps -> blocks stay resident across grid steps (no re-DMA).
        pl.BlockSpec((IN_DIM, H1), lambda i: (0, 0)),      # w1
        pl.BlockSpec((1, H1), lambda i: (0, 0)),           # b1
        pl.BlockSpec((H1, H2), lambda i: (0, 0)),          # w2
        pl.BlockSpec((1, H2), lambda i: (0, 0)),           # b2
        pl.BlockSpec((H2, OUT_DIM), lambda i: (0, 0)),     # w3
        pl.BlockSpec((1, OUT_DIM), lambda i: (0, 0)),      # b3
    ]
    out_spec = pl.BlockSpec((tb, OUT_DIM), lambda i: (i, 0))

    x_bytes = jnp.dtype(compute_dtype).itemsize
    w_bytes = (IN_DIM * H1 + H1 * H2 + H2 * OUT_DIM) * x_bytes \
        + (H1 + H2 + OUT_DIM) * 4
    cost = pl.CostEstimate(
        flops=2 * B_pad * (IN_DIM * H1 + H1 * H2 + H2 * OUT_DIM),
        transcendentals=0,
        bytes_accessed=B_pad * IN_DIM * x_bytes + B_pad * OUT_DIM * 4 + w_bytes,
    )

    out = pl.pallas_call(
        _mlp_kernel,
        out_shape=jax.ShapeDtypeStruct((B_pad, OUT_DIM), jnp.float32),
        grid_spec=pltpu.PrefetchScalarGridSpec(
            num_scalar_prefetch=0,
            grid=(grid_b,),
            in_specs=in_specs,
            out_specs=out_spec,
        ),
        compiler_params=pltpu.CompilerParams(
            dimension_semantics=("parallel",),
        ),
        cost_estimate=cost,
    )(x_in, w1, b1, w2, b2, w3, b3)

    return out[:B] if B_pad != B else out


def init_params(key):
    """Deterministic parameter init matching PyTorch Linear shapes.

    PyTorch stores weight as (out, in); we store the transpose (in, out) so the
    kernel does x @ W + b.  Kaiming-uniform-like scaling (same as nn.Linear default).
    """
    keys = jax.random.split(key, 6)

    def linear(kw, kb, fan_in, fan_out):
        bound = 1.0 / jnp.sqrt(fan_in)
        w = jax.random.uniform(kw, (fan_in, fan_out), jnp.float32, -bound, bound)
        b = jax.random.uniform(kb, (1, fan_out), jnp.float32, -bound, bound)
        return w, b

    w1, b1 = linear(keys[0], keys[1], IN_DIM, H1)
    w2, b2 = linear(keys[2], keys[3], H1, H2)
    w3, b3 = linear(keys[4], keys[5], H2, OUT_DIM)
    return {"w1": w1, "b1": b1, "w2": w2, "b2": b2, "w3": w3, "b3": b3}


def _reference(x, p, compute_dtype=jnp.bfloat16):
    """Pure-JAX reference that mirrors the kernel's dtype strategy exactly."""
    xc = x.astype(compute_dtype)
    w1 = p["w1"].astype(compute_dtype)
    w2 = p["w2"].astype(compute_dtype)
    w3 = p["w3"].astype(compute_dtype)
    h = jnp.maximum(jnp.dot(xc, w1, preferred_element_type=jnp.float32) + p["b1"], 0.0)
    h = h.astype(compute_dtype)
    h = jnp.maximum(jnp.dot(h, w2, preferred_element_type=jnp.float32) + p["b2"], 0.0)
    h = h.astype(compute_dtype)
    h = jnp.maximum(jnp.dot(h, w3, preferred_element_type=jnp.float32) + p["b3"], 0.0)
    return h


if __name__ == "__main__":
    key = jax.random.PRNGKey(0)
    k_x, k_p = jax.random.split(key)

    params = init_params(k_p)

    # Small single-tile case.
    B = 8
    x = jax.random.normal(k_x, (B, IN_DIM), jnp.float32)
    out = jax.block_until_ready(recognizer_forward(x, params))
    ref = _reference(x, params)
    assert out.shape == (B, OUT_DIM)
    assert jnp.allclose(out, ref, atol=1e-3, rtol=1e-3), "mismatch vs reference (B=8)"

    # Multi-tile, non-divisible batch (exercises cdiv + padding path).
    B2 = 20
    x2 = jax.random.normal(k_x, (B2, IN_DIM), jnp.float32)
    out2 = jax.block_until_ready(recognizer_forward(x2, params, batch_tile=8))
    ref2 = _reference(x2, params)
    assert out2.shape == (B2, OUT_DIM)
    assert jnp.allclose(out2, ref2, atol=1e-3, rtol=1e-3), "mismatch vs reference (B=20)"

    print("KERNEL_OK")
</pallas_src>

<mosaic_0001>
module attributes {stable_mosaic.version = 11 : i64} {
  func.func @_mlp_kernel(%arg0: i32, %arg1: memref<8x784xbf16, #tpu.memory_space<vmem>>, %arg2: memref<784x20xbf16, #tpu.memory_space<vmem>>, %arg3: memref<1x20xf32, #tpu.memory_space<vmem>>, %arg4: memref<20x20xbf16, #tpu.memory_space<vmem>>, %arg5: memref<1x20xf32, #tpu.memory_space<vmem>>, %arg6: memref<20x10xbf16, #tpu.memory_space<vmem>>, %arg7: memref<1x10xf32, #tpu.memory_space<vmem>>, %arg8: memref<8x10xf32, #tpu.memory_space<vmem>>) attributes {dimension_semantics = [#tpu.dimension_semantics<parallel>], iteration_bounds = array<i64: 1>, scalar_prefetch = 0 : i64, scratch_operands = 0 : i64, tpu.core_type = #tpu.core_type<tc>, window_params = [{transform_indices = @transform_0, window_bounds = array<i64: 8, 784>}, {pipeline_mode = #tpu.pipeline_mode<synchronous>, transform_indices = @transform_1, window_bounds = array<i64: 784, 20>}, {pipeline_mode = #tpu.pipeline_mode<synchronous>, transform_indices = @transform_2, window_bounds = array<i64: 1, 20>}, {pipeline_mode = #tpu.pipeline_mode<synchronous>, transform_indices = @transform_3, window_bounds = array<i64: 20, 20>}, {pipeline_mode = #tpu.pipeline_mode<synchronous>, transform_indices = @transform_4, window_bounds = array<i64: 1, 20>}, {pipeline_mode = #tpu.pipeline_mode<synchronous>, transform_indices = @transform_5, window_bounds = array<i64: 20, 10>}, {pipeline_mode = #tpu.pipeline_mode<synchronous>, transform_indices = @transform_6, window_bounds = array<i64: 1, 10>}, {transform_indices = @transform_7, window_bounds = array<i64: 8, 10>}]} {
    %c0 = arith.constant 0 : index
    %c0_0 = arith.constant 0 : index
    %0 = vector.load %arg1[%c0, %c0_0] : memref<8x784xbf16, #tpu.memory_space<vmem>>, vector<8x784xbf16>
    %c0_1 = arith.constant 0 : index
    %c0_2 = arith.constant 0 : index
    %1 = vector.load %arg2[%c0_1, %c0_2] : memref<784x20xbf16, #tpu.memory_space<vmem>>, vector<784x20xbf16>
    %cst = arith.constant dense<0.000000e+00> : vector<8x20xf32>
    %2 = tpu.matmul %0, %1, %cst {dimension_numbers = #tpu.dot_dimension_numbers<[1], [0], [0], [1], [0, 0, 1, 1], [], []>} : vector<8x784xbf16>, vector<784x20xbf16>, vector<8x20xf32> -> vector<8x20xf32>
    %c0_3 = arith.constant 0 : index
    %c0_4 = arith.constant 0 : index
    %3 = vector.load %arg3[%c0_3, %c0_4] : memref<1x20xf32, #tpu.memory_space<vmem>>, vector<1x20xf32>
    %4 = vector.broadcast %3 : vector<1x20xf32> to vector<8x20xf32>
    %5 = arith.addf %2, %4 : vector<8x20xf32>
    %cst_5 = arith.constant 0.000000e+00 : f32
    %6 = vector.broadcast %cst_5 : f32 to vector<8x20xf32>
    %7 = arith.maximumf %5, %6 : vector<8x20xf32>
    %8 = arith.truncf %7 : vector<8x20xf32> to vector<8x20xbf16>
    %c0_6 = arith.constant 0 : index
    %c0_7 = arith.constant 0 : index
    %9 = vector.load %arg4[%c0_6, %c0_7] : memref<20x20xbf16, #tpu.memory_space<vmem>>, vector<20x20xbf16>
    %cst_8 = arith.constant dense<0.000000e+00> : vector<8x20xf32>
    %10 = tpu.matmul %8, %9, %cst_8 {dimension_numbers = #tpu.dot_dimension_numbers<[1], [0], [0], [1], [0, 0, 1, 1], [], []>} : vector<8x20xbf16>, vector<20x20xbf16>, vector<8x20xf32> -> vector<8x20xf32>
    %c0_9 = arith.constant 0 : index
    %c0_10 = arith.constant 0 : index
    %11 = vector.load %arg5[%c0_9, %c0_10] : memref<1x20xf32, #tpu.memory_space<vmem>>, vector<1x20xf32>
    %12 = vector.broadcast %11 : vector<1x20xf32> to vector<8x20xf32>
    %13 = arith.addf %10, %12 : vector<8x20xf32>
    %cst_11 = arith.constant 0.000000e+00 : f32
    %14 = vector.broadcast %cst_11 : f32 to vector<8x20xf32>
    %15 = arith.maximumf %13, %14 : vector<8x20xf32>
    %16 = arith.truncf %15 : vector<8x20xf32> to vector<8x20xbf16>
    %c0_12 = arith.constant 0 : index
    %c0_13 = arith.constant 0 : index
    %17 = vector.load %arg6[%c0_12, %c0_13] : memref<20x10xbf16, #tpu.memory_space<vmem>>, vector<20x10xbf16>
    %cst_14 = arith.constant dense<0.000000e+00> : vector<8x10xf32>
    %18 = tpu.matmul %16, %17, %cst_14 {dimension_numbers = #tpu.dot_dimension_numbers<[1], [0], [0], [1], [0, 0, 1, 1], [], []>} : vector<8x20xbf16>, vector<20x10xbf16>, vector<8x10xf32> -> vector<8x10xf32>
    %c0_15 = arith.constant 0 : index
    %c0_16 = arith.constant 0 : index
    %19 = vector.load %arg7[%c0_15, %c0_16] : memref<1x10xf32, #tpu.memory_space<vmem>>, vector<1x10xf32>
    %20 = vector.broadcast %19 : vector<1x10xf32> to vector<8x10xf32>
    %21 = arith.addf %18, %20 : vector<8x10xf32>
    %cst_17 = arith.constant 0.000000e+00 : f32
    %22 = vector.broadcast %cst_17 : f32 to vector<8x10xf32>
    %23 = arith.maximumf %21, %22 : vector<8x10xf32>
    %c0_18 = arith.constant 0 : index
    %c0_19 = arith.constant 0 : index
    %24 = vector.load %arg8[%c0_18, %c0_19] : memref<8x10xf32, #tpu.memory_space<vmem>>, vector<8x10xf32>
    tpu.vector_store %arg8[%c0_18, %c0_19], %23 {strides = array<i32>} : memref<8x10xf32, #tpu.memory_space<vmem>>, vector<8x10xf32>,
    return
  }
  func.func @transform_0(%arg0: i32) -> (i32, i32) {
    %c0_i32 = arith.constant 0 : i32
    %c0_i32_0 = arith.constant 0 : i32
    return %arg0, %c0_i32 : i32, i32
  }
  func.func @transform_1(%arg0: i32) -> (i32, i32) {
    %c0_i32 = arith.constant 0 : i32
    %c0_i32_0 = arith.constant 0 : i32
    %c0_i32_1 = arith.constant 0 : i32
    return %c0_i32, %c0_i32_0 : i32, i32
  }
  func.func @transform_2(%arg0: i32) -> (i32, i32) {
    %c0_i32 = arith.constant 0 : i32
    %c0_i32_0 = arith.constant 0 : i32
    %c0_i32_1 = arith.constant 0 : i32
    return %c0_i32, %c0_i32_0 : i32, i32
  }
  func.func @transform_3(%arg0: i32) -> (i32, i32) {
    %c0_i32 = arith.constant 0 : i32
    %c0_i32_0 = arith.constant 0 : i32
    %c0_i32_1 = arith.constant 0 : i32
    return %c0_i32, %c0_i32_0 : i32, i32
  }
  func.func @transform_4(%arg0: i32) -> (i32, i32) {
    %c0_i32 = arith.constant 0 : i32
    %c0_i32_0 = arith.constant 0 : i32
    %c0_i32_1 = arith.constant 0 : i32
    return %c0_i32, %c0_i32_0 : i32, i32
  }
  func.func @transform_5(%arg0: i32) -> (i32, i32) {
    %c0_i32 = arith.constant 0 : i32
    %c0_i32_0 = arith.constant 0 : i32
    %c0_i32_1 = arith.constant 0 : i32
    return %c0_i32, %c0_i32_0 : i32, i32
  }
  func.func @transform_6(%arg0: i32) -> (i32, i32) {
    %c0_i32 = arith.constant 0 : i32
    %c0_i32_0 = arith.constant 0 : i32
    %c0_i32_1 = arith.constant 0 : i32
    return %c0_i32, %c0_i32_0 : i32, i32
  }
  func.func @transform_7(%arg0: i32) -> (i32, i32) {
    %c0_i32 = arith.constant 0 : i32
    %c0_i32_0 = arith.constant 0 : i32
    return %arg0, %c0_i32 : i32, i32
  }
}

</mosaic_0001>

<bundles_post_ra>
// kernel: tpu_custom_call.1
= control target key start
LH: loop header
LB: loop body
LE: loop exit
PB: predicated region body
PF: predicated region fallthrough
CT: control target
= control target key end

     0   :  { %v1021_v43 = vmov 0.0   ;;  %vm1022_vm0 = vmmov 0   ;;  %vm455_vm1 = vcmask 130048   ;;  %s1271_s0 = inlined_call_operand.vmem [shape: bf16[8,784], index: 0, kind: input, shape index: {}]   ;;  %s1272_s1 = inlined_call_operand.vmem [shape: bf16[784,20], index: 1, kind: input, shape index: {}]   ;;  %s1273_s2 = inlined_call_operand.vmem [shape: f32[1,20], index: 2, kind: input, shape index: {}]   ;;  %s1274_s3 = inlined_call_operand.vmem [shape: bf16[20,20], index: 3, kind: input, shape index: {}]   ;;  %s1275_s4 = inlined_call_operand.vmem [shape: f32[1,20], index: 4, kind: input, shape index: {}]   ;;  %s1276_s5 = inlined_call_operand.vmem [shape: bf16[20,10], index: 5, kind: input, shape index: {}]   ;;  %s1277_s6 = inlined_call_operand.vmem [shape: f32[1,10], index: 6, kind: input, shape index: {}]   ;;  %s1278_s7 = inlined_call_operand.hbm [shape: f32[8,10], index: 7, kind: output, shape index: {}]  }
   0x1   :  { %v937_v0 = vld [vmem:[%s1272_s1 + $0x40] sm:$0xff]   ;;  %v941_v4 = vld [vmem:[%s1272_s1 + $0x48] sm:$0xff]   ;;  %v945_v8 = vld [vmem:[%s1272_s1 + $0x50] sm:$0xff]  }
   0x2   :  { %v938_v1 = vld [vmem:[%s1272_s1] sm:$0xff]   ;;  %838 = vmatprep.subr.bf16.mxu0 %v937_v0  ;;  %v942_v5 = vld [vmem:[%s1272_s1 + $0x8] sm:$0xff]   ;;  %v946_v9 = vld [vmem:[%s1272_s1 + $0x10] sm:$0xff]  }
   0x3   :  { %v939_v2 = vld [vmem:[%s1272_s1 + $0xc0] sm:$0xff]   ;;  %839 = vmatpush3.bf16.msra.mxu0 %v938_v1  ;;  %v943_v6 = vld [vmem:[%s1272_s1 + $0xc8] sm:$0xff]   ;;  %v947_v10 = vld [vmem:[%s1272_s1 + $0xd0] sm:$0xff]  }
   0x4   :  { %v940_v3 = vld [vmem:[%s1272_s1 + $0x80] sm:$0xff]   ;;  %860 = vmatprep.subr.bf16.mxu1 %v939_v2  ;;  %840 = vmatprep.subr.bf16.mxu0 %v941_v4  ;;  %v944_v7 = vld [vmem:[%s1272_s1 + $0x88] sm:$0xff]   ;;  %v948_v11 = vld [vmem:[%s1272_s1 + $0x90] sm:$0xff]  }
   0x5   :  { %861 = vmatpush3.bf16.msra.mxu1 %v940_v3  ;;  %v949_v12 = vld [vmem:[%s1272_s1 + $0x58] sm:$0xff]   ;;  %v953_v16 = vld [vmem:[%s1272_s1 + $0x60] sm:$0xff]   ;;  %v957_v20 = vld [vmem:[%s1272_s1 + $0x68] sm:$0xff]  }
   0x6   :  { %862 = vmatprep.subr.bf16.mxu1 %v943_v6  ;;  %v950_v13 = vld [vmem:[%s1272_s1 + $0x18] sm:$0xff]   ;;  %v954_v17 = vld [vmem:[%s1272_s1 + $0x20] sm:$0xff]   ;;  %v958_v21 = vld [vmem:[%s1272_s1 + $0x28] sm:$0xff]  }
   0x7   :  { %841 = vmatpush3.bf16.msra.mxu0 %v942_v5  ;;  %v951_v14 = vld [vmem:[%s1272_s1 + $0xd8] sm:$0xff]   ;;  %v955_v18 = vld [vmem:[%s1272_s1 + $0xe0] sm:$0xff]   ;;  %v959_v22 = vld [vmem:[%s1272_s1 + $0xe8] sm:$0xff]  }
   0x8   :  { %842 = vmatprep.subr.bf16.mxu0 %v945_v8  ;;  %v952_v15 = vld [vmem:[%s1272_s1 + $0x98] sm:$0xff]   ;;  %v956_v19 = vld [vmem:[%s1272_s1 + $0xa0] sm:$0xff]   ;;  %v960_v23 = vld [vmem:[%s1272_s1 + $0xa8] sm:$0xff]  }
   0x9   :  { %863 = vmatpush3.bf16.msra.mxu1 %v944_v7  ;;  %v961_v24 = vld [vmem:[%s1272_s1 + $0x70] sm:$0xff]   ;;  %v965_v28 = vld [vmem:[%s1272_s1 + $0x78] sm:$0xff]   ;;  %v28_v31 = vld [vmem:[%s1271_s0] sm:$0xff] }
   0xa   :  { %864 = vmatprep.subr.bf16.mxu1 %v947_v10  ;;  %v962_v25 = vld [vmem:[%s1272_s1 + $0x30] sm:$0xff]   ;;  %v966_v29 = vld [vmem:[%s1272_s1 + $0x38] sm:$0xff]   ;;  %v773_v32 = vcombine.low %v28_v31, %v28_v31  ;;  %v774_v33 = vcombine.high %v28_v31, %v28_v31  ;;  %v971_v35 = vld [vmem:[%s1272_s1 + $0x140] sm:$0xff]  }
   0xb   :  { %843 = vmatpush3.bf16.msra.mxu0 %v946_v9  ;;  %v963_v26 = vld [vmem:[%s1272_s1 + $0xf0] sm:$0xff]   ;;  %v967_v30 = vld [vmem:[%s1272_s1 + $0xf8] sm:$0xff]   ;;  %v29_v36 = vld [vmem:[%s1271_s0 + $0x8] sm:$0xff] }
   0xc   :  { %844 = vmatprep.subr.bf16.mxu0 %v949_v12  ;;  %v964_v27 = vld [vmem:[%s1272_s1 + $0xb0] sm:$0xff]   ;;  %v970_v34 = vld [vmem:[%s1272_s1 + $0xb8] sm:$0xff]   ;;  %491 = vmatprep.mubr.bf16.mxu0 %v774_v33  ;;  %v775_v37 = vcombine.low %v29_v36, %v29_v36  ;;  %v776_v38 = vcombine.high %v29_v36, %v29_v36  ;;  %v974_v39 = vld [vmem:[%s1272_s1 + $0x100] sm:$0xff]  }
   0xd   :  { %865 = vmatpush3.bf16.msra.mxu1 %v948_v11  ;;  %v975_v40 = vld [vmem:[%s1272_s1 + $0x148] sm:$0xff]   ;;  %v977_v42 = vld [vmem:[%s1272_s1 + $0x150] sm:$0xff]   ;;  %v979_v45 = vld [vmem:[%s1272_s1 + $0x158] sm:$0xff]  }
   0xe   :  { %866 = vmatprep.subr.bf16.mxu1 %v951_v14  ;;  %531 = vmatprep.mubr.bf16.mxu1 %v776_v38  ;;  %v976_v41 = vld [vmem:[%s1272_s1 + $0x108] sm:$0xff]   ;;  %v978_v44 = vld [vmem:[%s1272_s1 + $0x110] sm:$0xff]   ;;  %v980_v46 = vld [vmem:[%s1272_s1 + $0x118] sm:$0xff]  }
   0xf   :  { %845 = vmatpush3.bf16.msra.mxu0 %v950_v13  ;;  %v981_v47 = vld [vmem:[%s1272_s1 + $0x160] sm:$0xff]   ;;  %v983_v49 = vld [vmem:[%s1272_s1 + $0x168] sm:$0xff]   ;;  %v30_v51 = vld [vmem:[%s1271_s0 + $0x10] sm:$0xff] }
  0x10   :  { %846 = vmatprep.subr.bf16.mxu0 %v953_v16  ;;  %v982_v48 = vld [vmem:[%s1272_s1 + $0x120] sm:$0xff]   ;;  %v984_v52 = vld [vmem:[%s1272_s1 + $0x128] sm:$0xff]   ;;  %v778_v53 = vcombine.high %v30_v51, %v30_v51  ;;  %v992_v54 = vld [vmem:[%s1271_s0 + $0x18] ss:$0 sps:$4 sm:$0xff]  }
  0x11   :  { %867 = vmatpush3.bf16.msra.mxu1 %v952_v15  ;;  %v989_v50 = vld [vmem:[%s1272_s1 + $0x180] sm:$0xff]  }
  0x12   :  { %868 = vmatprep.subr.bf16.mxu1 %v955_v18 }
  0x13   :  { %847 = vmatpush3.bf16.msra.mxu0 %v954_v17 }
  0x14   :  { %848 = vmatprep.subr.bf16.mxu0 %v957_v20 }
  0x15   :  { %869 = vmatpush3.bf16.msra.mxu1 %v956_v19 }
  0x16   :  { %870 = vmatprep.subr.bf16.mxu1 %v959_v22 }
  0x17   :  { %849 = vmatpush3.bf16.msra.mxu0 %v958_v21 }
  0x18   :  { %850 = vmatprep.subr.bf16.mxu0 %v961_v24 }
  0x19   :  { %871 = vmatpush3.bf16.msra.mxu1 %v960_v23 }
  0x1a   :  { %872 = vmatprep.subr.bf16.mxu1 %v963_v26 }
  0x1b   :  { %851 = vmatpush3.bf16.msra.mxu0 %v962_v25 }
  0x1c   :  { %852 = vmatprep.subr.bf16.mxu0 %v965_v28 }
  0x1d   :  { %873 = vmatpush3.bf16.msra.mxu1 %v964_v27 }
  0x1e   :  { %874 = vmatprep.subr.bf16.mxu1 %v967_v30 }
  0x1f   :  { %853 = vmatpush3.bf16.msra.mxu0 %v966_v29 }
  0x20   :  { %882 = vmatprep.subr.bf16.mxu0 %v971_v35 }
  0x21   :  { %875 = vmatpush3.bf16.msra.mxu1 %v970_v34 }
  0x22   :  { %492 = vmatmul.mubr.bf16.vlgmr.msra.gmra.mrb[0].mxu0 %v773_v32  ;;  %912 = vmatprep.subr.bf16.mxu1 %v1021_v43 }
  0x23   :  { %883 = vmatpush3.bf16.msra.mxu0 %v974_v39  ;;  %571 = vmatprep.mubr.bf16.mxu0 %v778_v53 }
  0x24   :  { %532 = vmatmul.mubr.bf16.vlgmr.msra.gmra.mrb[0].mxu1 %v775_v37  ;;  %884 = vmatprep.subr.bf16.mxu0 %v975_v40 }
  0x25   :  { %914 = vmatprep.mubr.msk.bf16.mxu1 %vm1022_vm0, %v1021_v43  ;;  %913 = vmatpush3.bf16.msra.mxu1 %v989_v50 }
  0x27   :  { %885 = vmatpush3.bf16.msra.mxu0 %v976_v41 }
  0x28   :  { %886 = vmatprep.subr.bf16.mxu0 %v977_v42 }
  0x2b   :  { %887 = vmatpush3.bf16.msra.mxu0 %v978_v44 }
  0x2c   :  { %888 = vmatprep.subr.bf16.mxu0 %v979_v45 }
  0x2f   :  { %889 = vmatpush3.bf16.msra.mxu0 %v980_v46 }
  0x30   :  { %890 = vmatprep.subr.bf16.mxu0 %v981_v47 }
  0x33   :  { %891 = vmatpush3.bf16.msra.mxu0 %v982_v48 }
  0x34   :  { %12 = vsyncpa [#allocation3], 0  ;;  %892 = vmatprep.subr.bf16.mxu0 %v983_v49  ;;  %v985_v55 = vld [vmem:[%s1272_s1 + $0x170] sm:$0xff]   ;;  %918 = vmatprep.subr.bf16.mxu1 %v1021_v43  ;;  %v987_v57 = vld [vmem:[%s1272_s1 + $0x178] sm:$0xff]   ;;  %v777_v59 = vcombine.low %v30_v51, %v30_v51  ;;  %vm644_vm2 = vcmask 1041408   ;;  %vm640_vm3 = vcmask 162816  }
  0x35   :  { %915 = vmatmul.mubr.msk.bf16.vlgmr.msra.gmra.mrb[4].mxu1 %vm455_vm1, %v992_v54  ;;  %v986_v56 = vld [vmem:[%s1272_s1 + $0x130] sm:$0xff]   ;;  %v988_v58 = vld [vmem:[%s1272_s1 + $0x138] sm:$0xff]   ;;  %v993_v60 = vld [vmem:[%s1274_s3] sm:$0xff]   ;;  %vm756_vm4 = vcmask 80896  }
  0x36   :  { %922 = vmatprep.mubr.msk.bf16.mxu1 %vm1022_vm0, %v1021_v43  ;;  %919 = vmatpush3.bf16.msra.mxu1 %v993_v60  ;;  %v994_v61 = vld [vmem:[%s1274_s3 + $0x8] ss:$0 sps:$4 sm:$0x33]   ;;  %v772_v0 = vld [vmem:[%s1273_s2] ss:$0 sm:$0xff] }
  0x37   :  { %893 = vmatpush3.bf16.msra.mxu0 %v984_v52  ;;  %920 = vmatprep.subr.bf16.mxu1 %v1021_v43  ;;  %v646_v62 = vsel %vm644_vm2, %v994_v61, 0  ;;  %v995_v24 = vld [vmem:[%s1276_s5] sm:$0xff]   ;;  %v996_v26 = vld [vmem:[%s1276_s5 + $0x8] ss:$0 sps:$4 sm:$0x33]   ;;  %s1023_s5 = smov [#allocation2]  }
  0x38   :  { %894 = vmatprep.subr.bf16.mxu0 %v985_v55  ;;  %v713_v27 = vsel %vm644_vm2, %v996_v26, 0  ;;  %v830_v28 = vld [vmem:[%s1275_s4] ss:$0 sm:$0xff]  ;;  %s764_s25 = sshll.u32 %s1023_s5, 4  ;;  %s765_s25 = int_to_ptr.vmem [resolvable:$true] %s764_s25 }
  0x39   :  { %v834_v36 = vld [vmem:[%s1277_s6] ss:$0 sm:$0xff]  ;;  %s997_s4 = scalar_lea.vmem %s765_s25, 128  ;;  %p1002_p1 = scmp.lt.s32.totalorder %s765_s25, %s765_s25 }
  0x3a   :  { %921 = vmatpush3.bf16.msra.mxu1 %v646_v62  ;;  %p998_p0 = scmp.ne.s32.totalorder %s765_s25, %s997_s4  ;;  %p1003_p2 = scmp.lt.s32.totalorder %s997_s4, %s997_s4 }
  0x3b   :  { %895 = vmatpush3.bf16.msra.mxu0 %v986_v56  ;;  %926 = vmatprep.subr.bf16.mxu1 %v1021_v43 }
  0x3c   :  { %896 = vmatprep.subr.bf16.mxu0 %v987_v57  ;;  %p1004_p3 = por %p1003_p2, %p1002_p1 }
  0x3e   :  { %p1005_p4 = pnand %p1004_p3, %p998_p0 }
  0x3f   :  { %897 = vmatpush3.bf16.msra.mxu0 %v988_v58 }
  0x42   :  { %572 = vmatmul.mubr.bf16.vlgmr.msra.gmra.mrb[4].mxu0 %v777_v59 }
  0xf5   :  { %v854_v63 = vpop.f32.mrb[0].mxu0 }
  0xf6   :  { %v855_v1 = vpop.f32.mrb[1].mxu0 }
  0xf7   :  { %v856_v2 = vadd.f32 %v855_v1, %v854_v63  ;;  %v857_v3 = vpop.f32.mrb[2].mxu0  ;;  %v876_v4 = vpop.f32.mrb[0].mxu1 }
  0xf8   :  { %v858_v5 = vpop.f32.mrb[3].mxu0  ;;  %v877_v6 = vpop.f32.mrb[1].mxu1 }
  0xf9   :  { %v494_v7 = vadd.f32 %v856_v2, %v772_v0  ;;  %v878_v8 = vadd.f32 %v877_v6, %v876_v4  ;;  %v879_v9 = vpop.f32.mrb[2].mxu1 }
  0xfa   :  { %v880_v10 = vpop.f32.mrb[3].mxu1 }
  0xfb   :  { %v534_v11 = vadd.f32 %v878_v8, %v494_v7 }
 0x108   :  { %v613_v12 = vpop.f32.mrb[4].mxu1 }
 0x109   :  { %v916_v13 = vpop.f32.mrb[5].mxu1 }
 0x10a   :  { %v616_v14 = vpop.f32.mrb[6].mxu1 }
 0x10b   :  { %v917_v15 = vpop.f32.mrb[7].mxu1 }
 0x115   :  { %v898_v16 = vpop.f32.mrb[4].mxu0 }
 0x116   :  { %v899_v17 = vpop.f32.mrb[5].mxu0 }
 0x117   :  { %v900_v18 = vadd.f32 %v899_v17, %v898_v16  ;;  %v901_v19 = vpop.f32.mrb[6].mxu0 }
 0x118   :  { %v902_v20 = vpop.f32.mrb[7].mxu0 }
 0x119   :  { %v574_v21 = vadd.f32 %v900_v18, %v534_v11 }
 0x11b   :  { %v614_v22 = vadd.f32 %v613_v12, %v574_v21 }
 0x11d   :  { %v619_v23 = vmax.f32 %v614_v22, 0.0 }
 0x11f   :  { %v620_v25 = vpack.c.bf16 %v619_v23, %v619_v23 }
 0x121   :  { %923 = vmatmul.mubr.msk.bf16.vlgmr.msra.gmra.mrb[8].mxu1 %vm640_vm3, %v620_v25 }
 0x122   :  { %927 = vmatpush3.bf16.msra.mxu1 %v995_v24  ;;  %930 = vmatprep.mubr.msk.bf16.mxu1 %vm1022_vm0, %v1021_v43 }
 0x123   :  { %928 = vmatprep.subr.bf16.mxu1 %v1021_v43 }
 0x126   :  { %929 = vmatpush3.bf16.msra.mxu1 %v713_v27 }
 0x1f4   :  { %v682_v29 = vpop.f32.mrb[8].mxu1 }
 0x1f5   :  { %v683_v30 = vadd.f32 %v830_v28, %v682_v29  ;;  %v924_v31 = vpop.f32.mrb[9].mxu1 }
 0x1f6   :  { %v685_v32 = vpop.f32.mrb[10].mxu1 }
 0x1f7   :  { %v688_v33 = vmax.f32 %v683_v30, 0.0  ;;  %v925_v34 = vpop.f32.mrb[11].mxu1 }
 0x1f9   :  { %v689_v35 = vpack.c.bf16 %v688_v33, %v688_v33 }
 0x1fb   :  { %931 = vmatmul.mubr.msk.bf16.vlgmr.msra.gmra.mrb[12].mxu1 %vm640_vm3, %v689_v35 }
 0x2ce   :  { %v749_v37 = vpop.f32.mrb[12].mxu1 }
 0x2cf   :  { %v750_v38 = vadd.f32 %v834_v36, %v749_v37  ;;  %v932_v39 = vpop.f32.mrb[13].mxu1 }
 0x2d0   :  { %v752_v40 = vpop.f32.mrb[14].mxu1 }
 0x2d1   :  { %v755_v41 = vmax.f32 %v750_v38, 0.0  ;;  %v933_v42 = vpop.f32.mrb[15].mxu1 }
 0x2d3   :  { %757 = vst.msk [vmem:[#allocation2] sm:$0xff] %vm756_vm4, %v755_v41 }
 0x2d4   :  { %1008 = shalt.err (!%p1005_p4)
}
 0x2d5   :  { %s1009_s27 = scalar_lea.hbm %s1278_s7, 128 }
 0x2d6   :  { %p1010_p5 = scmp.ne.s32.totalorder %s1278_s7, %s1009_s27  ;;  %p1013_p6 = scmp.lt.u32.totalorder %s1009_s27, %s1278_s7 }
 0x2d8   :  { %p1015_p7 = pnand %p1013_p6, %p1010_p5 }
 0x2da   :  { %1018 = shalt.err (!%p1015_p7)
}
 0x2db   :  { %767 = dma.vmem_to_hbm [thread:$0]  %s765_s25, 128, %s1278_s7, [#allocation3]  }
 0x2dc   :  { %1019 = dma.done.wait [#allocation3], 128  }
 0x2dd   :  { %1020 = vsyncadd [#allocation3], 4294967168 }
 0x2de   :  { %771 = vsyncpa [#allocation3], 1 }

</bundles_post_ra>
